<compile_context>
chip_gen: v6e
topology: v6e:2x2x1
jax: 0.10.0
libtpu: 0.0.40
codegen_flags: <defaults>
</compile_context>

<pallas_src>
import functools
import math

import jax
import jax.numpy as jnp
from jax.experimental import pallas as pl
from jax.experimental.pallas import tpu as pltpu

HIDDEN = 64


def _round_up(x, m):
    return ((x + m - 1) // m) * m


def _ppo_eval_kernel(state_ref, action_ref,
                     w1_ref, b1_ref, w2_ref, b2_ref, w3_ref, b3_ref,
                     inv_var_ref, out_ref):
    x = state_ref[...]                       # (TB, S)  f32
    a = action_ref[...]                      # (TB, A)  f32

    # Fused actor+critic trunk: two 128-lane matmuls + tanh.
    h = jnp.tanh(jnp.dot(x, w1_ref[...], preferred_element_type=jnp.float32)
                 + b1_ref[...])              # (TB, 128)
    h = jnp.tanh(jnp.dot(h, w2_ref[...], preferred_element_type=jnp.float32)
                 + b2_ref[...])              # (TB, 128)

    # Head: first A lanes = actor pre-activation, last lane = critic value.
    z = (jnp.dot(h, w3_ref[...], preferred_element_type=jnp.float32)
         + b3_ref[...])                      # (TB, A+1)

    act_dim = a.shape[-1]
    action_mean = jnp.tanh(z[:, :act_dim])   # (TB, A)
    state_val = z[:, act_dim:act_dim + 1]    # (TB, 1)  (no tanh on critic head)

    # Diag-Gaussian: only the state/action-dependent part; constants added
    # in the wrapper (-0.5 * (A*log(2*pi) + sum(log(var)))).
    diff = a - action_mean
    maha = jnp.sum(diff * diff * inv_var_ref[...], axis=-1, keepdims=True)
    logp_part = -0.5 * maha                  # (TB, 1)

    out_ref[...] = jnp.concatenate([logp_part, state_val], axis=-1)  # (TB, 2)


@functools.partial(jax.jit, static_argnames=("tb",))
def ppo_evaluate(state, action, params, action_var, *, tb=1024):
    """Pallas equivalent of PPO_ActorCritic.evaluate (continuous branch).

    Returns (action_logprobs [B], state_values [B,1], dist_entropy [B]).
    """
    state = state.astype(jnp.float32)
    action = action.astype(jnp.float32)
    action_var = action_var.astype(jnp.float32)

    B, S = state.shape
    A = action.shape[1]

    (aw1, ab1, aw2, ab2, aw3, ab3,
     cw1, cb1, cw2, cb2, cw3, cb3) = [jnp.asarray(p, jnp.float32) for p in params]
    H = aw1.shape[1]

    # ---- fuse actor + critic weights into lane-dense (128-wide) matmuls ----
    w1 = jnp.concatenate([aw1, cw1], axis=1)                        # (S, 2H)
    b1 = jnp.concatenate([ab1, cb1]).reshape(1, -1)                 # (1, 2H)
    w2 = jnp.zeros((2 * H, 2 * H), jnp.float32)
    w2 = w2.at[:H, :H].set(aw2).at[H:, H:].set(cw2)                 # block-diag
    b2 = jnp.concatenate([ab2, cb2]).reshape(1, -1)                 # (1, 2H)
    w3 = jnp.zeros((2 * H, A + 1), jnp.float32)
    w3 = w3.at[:H, :A].set(aw3).at[H:, A:].set(cw3)                 # block-diag
    b3 = jnp.concatenate([ab3, cb3]).reshape(1, -1)                 # (1, A+1)

    inv_var = (1.0 / action_var).reshape(1, -1)                     # (1, A)

    # ---- batch tiling (TB multiple of 8; pad B up to a tile multiple) ----
    tb = min(tb, _round_up(B, 8))
    Bp = _round_up(B, tb)
    if Bp != B:
        state = jnp.pad(state, ((0, Bp - B), (0, 0)))
        action = jnp.pad(action, ((0, Bp - B), (0, 0)))
    n_tiles = Bp // tb

    def batch_spec(cols):
        return pl.BlockSpec((tb, cols), lambda i: (i, 0))

    def const_spec(shape):
        return pl.BlockSpec(shape, lambda i: (0, 0))

    out = pl.pallas_call(
        _ppo_eval_kernel,
        out_shape=jax.ShapeDtypeStruct((Bp, 2), jnp.float32),
        grid_spec=pltpu.PrefetchScalarGridSpec(
            num_scalar_prefetch=0,
            grid=(n_tiles,),
            in_specs=[
                batch_spec(S),              # state
                batch_spec(A),              # action
                const_spec(w1.shape),       # fused layer-1 weight
                const_spec(b1.shape),
                const_spec(w2.shape),       # fused layer-2 weight
                const_spec(b2.shape),
                const_spec(w3.shape),       # fused head weight
                const_spec(b3.shape),
                const_spec(inv_var.shape),  # 1 / action_var
            ],
            out_specs=batch_spec(2),        # [logp_partial, state_value]
        ),
        compiler_params=pltpu.CompilerParams(
            dimension_semantics=("parallel",)),
    )(state, action, w1, b1, w2, b2, w3, b3, inv_var)

    out = out[:B]

    # ---- constant (state/action-independent) terms, hoisted out of kernel ----
    log_2pi = jnp.float32(math.log(2.0 * math.pi))
    sum_log_var = jnp.sum(jnp.log(action_var))
    logp = out[:, 0] - 0.5 * (A * log_2pi + sum_log_var)            # (B,)
    state_values = out[:, 1:2]                                      # (B, 1)
    dist_entropy = jnp.full((B,), 0.5 * A * (1.0 + log_2pi),
                            jnp.float32) + 0.5 * sum_log_var        # (B,)
    return logp, state_values, dist_entropy


def init_params(key, state_dim, action_dim):
    """Deterministic init mirroring nn.Linear default (U[-1/sqrt(fan_in), ..])."""
    def linear(key, fan_in, fan_out):
        kw, kb = jax.random.split(key)
        bound = 1.0 / math.sqrt(fan_in)
        w = jax.random.uniform(kw, (fan_in, fan_out), jnp.float32, -bound, bound)
        b = jax.random.uniform(kb, (fan_out,), jnp.float32, -bound, bound)
        return w, b

    keys = jax.random.split(key, 6)
    aw1, ab1 = linear(keys[0], state_dim, HIDDEN)
    aw2, ab2 = linear(keys[1], HIDDEN, HIDDEN)
    aw3, ab3 = linear(keys[2], HIDDEN, action_dim)
    cw1, cb1 = linear(keys[3], state_dim, HIDDEN)
    cw2, cb2 = linear(keys[4], HIDDEN, HIDDEN)
    cw3, cb3 = linear(keys[5], HIDDEN, 1)
    return (aw1, ab1, aw2, ab2, aw3, ab3, cw1, cb1, cw2, cb2, cw3, cb3)


def _reference(state, action, params, action_var):
    (aw1, ab1, aw2, ab2, aw3, ab3, cw1, cb1, cw2, cb2, cw3, cb3) = params
    h = jnp.tanh(state @ aw1 + ab1)
    h = jnp.tanh(h @ aw2 + ab2)
    mean = jnp.tanh(h @ aw3 + ab3)
    hc = jnp.tanh(state @ cw1 + cb1)
    hc = jnp.tanh(hc @ cw2 + cb2)
    val = hc @ cw3 + cb3
    d = mean.shape[-1]
    log_2pi = math.log(2.0 * math.pi)
    diff = action - mean
    logp = (-0.5 * jnp.sum(diff * diff / action_var, axis=-1)
            - 0.5 * d * log_2pi - 0.5 * jnp.sum(jnp.log(action_var)))
    ent = jnp.full((state.shape[0],),
                   0.5 * d * (1.0 + log_2pi) + 0.5 * jnp.sum(jnp.log(action_var)),
                   jnp.float32)
    return logp, val, ent


if __name__ == "__main__":
    STATE_DIM = 8
    ACTION_DIM = 4
    BATCH = 8
    ACTION_STD_INIT = 0.6

    key = jax.random.PRNGKey(0)
    k_params, k_state, k_action = jax.random.split(key, 3)

    params = init_params(k_params, STATE_DIM, ACTION_DIM)
    action_var = jnp.full((ACTION_DIM,), ACTION_STD_INIT * ACTION_STD_INIT,
                          dtype=jnp.float32)

    state = jax.random.normal(k_state, (BATCH, STATE_DIM), jnp.float32)
    action = jax.random.normal(k_action, (BATCH, ACTION_DIM), jnp.float32)

    logp, val, ent = ppo_evaluate(state, action, params, action_var)
    jax.block_until_ready((logp, val, ent))

    # lightweight sanity check vs. pure-JAX reference
    r_logp, r_val, r_ent = _reference(state, action, params, action_var)
    assert logp.shape == (BATCH,) and val.shape == (BATCH, 1) and ent.shape == (BATCH,)
    assert jnp.allclose(logp, r_logp, atol=1e-4), "logprob mismatch"
    assert jnp.allclose(val, r_val, atol=1e-4), "value mismatch"
    assert jnp.allclose(ent, r_ent, atol=1e-4), "entropy mismatch"

    print("KERNEL_OK")
</pallas_src>

<mosaic_0001>
module attributes {stable_mosaic.version = 11 : i64} {
  func.func @_ppo_eval_kernel(%arg0: i32, %arg1: memref<8x8xf32, #tpu.memory_space<vmem>>, %arg2: memref<8x4xf32, #tpu.memory_space<vmem>>, %arg3: memref<8x128xf32, #tpu.memory_space<vmem>>, %arg4: memref<1x128xf32, #tpu.memory_space<vmem>>, %arg5: memref<128x128xf32, #tpu.memory_space<vmem>>, %arg6: memref<1x128xf32, #tpu.memory_space<vmem>>, %arg7: memref<128x5xf32, #tpu.memory_space<vmem>>, %arg8: memref<1x5xf32, #tpu.memory_space<vmem>>, %arg9: memref<1x4xf32, #tpu.memory_space<vmem>>, %arg10: memref<8x2xf32, #tpu.memory_space<vmem>>) attributes {dimension_semantics = [#tpu.dimension_semantics<parallel>], iteration_bounds = array<i64: 1>, scalar_prefetch = 0 : i64, scratch_operands = 0 : i64, tpu.core_type = #tpu.core_type<tc>, window_params = [{transform_indices = @transform_0, window_bounds = array<i64: 8, 8>}, {transform_indices = @transform_1, window_bounds = array<i64: 8, 4>}, {pipeline_mode = #tpu.pipeline_mode<synchronous>, transform_indices = @transform_2, window_bounds = array<i64: 8, 128>}, {pipeline_mode = #tpu.pipeline_mode<synchronous>, transform_indices = @transform_3, window_bounds = array<i64: 1, 128>}, {pipeline_mode = #tpu.pipeline_mode<synchronous>, transform_indices = @transform_4, window_bounds = array<i64: 128, 128>}, {pipeline_mode = #tpu.pipeline_mode<synchronous>, transform_indices = @transform_5, window_bounds = array<i64: 1, 128>}, {pipeline_mode = #tpu.pipeline_mode<synchronous>, transform_indices = @transform_6, window_bounds = array<i64: 128, 5>}, {pipeline_mode = #tpu.pipeline_mode<synchronous>, transform_indices = @transform_7, window_bounds = array<i64: 1, 5>}, {pipeline_mode = #tpu.pipeline_mode<synchronous>, transform_indices = @transform_8, window_bounds = array<i64: 1, 4>}, {transform_indices = @transform_9, window_bounds = array<i64: 8, 2>}]} {
    %c0 = arith.constant 0 : index
    %c0_0 = arith.constant 0 : index
    %0 = vector.load %arg1[%c0, %c0_0] : memref<8x8xf32, #tpu.memory_space<vmem>>, vector<8x8xf32>
    %c0_1 = arith.constant 0 : index
    %c0_2 = arith.constant 0 : index
    %1 = vector.load %arg2[%c0_1, %c0_2] : memref<8x4xf32, #tpu.memory_space<vmem>>, vector<8x4xf32>
    %c0_3 = arith.constant 0 : index
    %c0_4 = arith.constant 0 : index
    %2 = vector.load %arg3[%c0_3, %c0_4] : memref<8x128xf32, #tpu.memory_space<vmem>>, vector<8x128xf32>
    %cst = arith.constant dense<0.000000e+00> : vector<8x128xf32>
    %3 = tpu.matmul %0, %2, %cst {dimension_numbers = #tpu.dot_dimension_numbers<[1], [0], [0], [1], [0, 0, 1, 1], [], []>} : vector<8x8xf32>, vector<8x128xf32>, vector<8x128xf32> -> vector<8x128xf32>
    %c0_5 = arith.constant 0 : index
    %c0_6 = arith.constant 0 : index
    %4 = vector.load %arg4[%c0_5, %c0_6] : memref<1x128xf32, #tpu.memory_space<vmem>>, vector<1x128xf32>
    %5 = vector.broadcast %4 : vector<1x128xf32> to vector<8x128xf32>
    %6 = arith.addf %3, %5 : vector<8x128xf32>
    %7 = math.tanh %6 : vector<8x128xf32>
    %c0_7 = arith.constant 0 : index
    %c0_8 = arith.constant 0 : index
    %8 = vector.load %arg5[%c0_7, %c0_8] : memref<128x128xf32, #tpu.memory_space<vmem>>, vector<128x128xf32>
    %cst_9 = arith.constant dense<0.000000e+00> : vector<8x128xf32>
    %9 = tpu.matmul %7, %8, %cst_9 {dimension_numbers = #tpu.dot_dimension_numbers<[1], [0], [0], [1], [0, 0, 1, 1], [], []>} : vector<8x128xf32>, vector<128x128xf32>, vector<8x128xf32> -> vector<8x128xf32>
    %c0_10 = arith.constant 0 : index
    %c0_11 = arith.constant 0 : index
    %10 = vector.load %arg6[%c0_10, %c0_11] : memref<1x128xf32, #tpu.memory_space<vmem>>, vector<1x128xf32>
    %11 = vector.broadcast %10 : vector<1x128xf32> to vector<8x128xf32>
    %12 = arith.addf %9, %11 : vector<8x128xf32>
    %13 = math.tanh %12 : vector<8x128xf32>
    %c0_12 = arith.constant 0 : index
    %c0_13 = arith.constant 0 : index
    %14 = vector.load %arg7[%c0_12, %c0_13] : memref<128x5xf32, #tpu.memory_space<vmem>>, vector<128x5xf32>
    %cst_14 = arith.constant dense<0.000000e+00> : vector<8x5xf32>
    %15 = tpu.matmul %13, %14, %cst_14 {dimension_numbers = #tpu.dot_dimension_numbers<[1], [0], [0], [1], [0, 0, 1, 1], [], []>} : vector<8x128xf32>, vector<128x5xf32>, vector<8x5xf32> -> vector<8x5xf32>
    %c0_15 = arith.constant 0 : index
    %c0_16 = arith.constant 0 : index
    %16 = vector.load %arg8[%c0_15, %c0_16] : memref<1x5xf32, #tpu.memory_space<vmem>>, vector<1x5xf32>
    %17 = vector.broadcast %16 : vector<1x5xf32> to vector<8x5xf32>
    %18 = arith.addf %15, %17 : vector<8x5xf32>
    %19 = vector.extract_strided_slice %18 {offsets = [0, 0], sizes = [8, 4], strides = [1, 1]} : vector<8x5xf32> to vector<8x4xf32>
    %20 = math.tanh %19 : vector<8x4xf32>
    %21 = vector.extract_strided_slice %18 {offsets = [0, 4], sizes = [8, 1], strides = [1, 1]} : vector<8x5xf32> to vector<8x1xf32>
    %22 = arith.subf %1, %20 : vector<8x4xf32>
    %23 = arith.mulf %22, %22 : vector<8x4xf32>
    %c0_17 = arith.constant 0 : index
    %c0_18 = arith.constant 0 : index
    %24 = vector.load %arg9[%c0_17, %c0_18] : memref<1x4xf32, #tpu.memory_space<vmem>>, vector<1x4xf32>
    %25 = vector.broadcast %24 : vector<1x4xf32> to vector<8x4xf32>
    %26 = arith.mulf %23, %25 : vector<8x4xf32>
    %cst_19 = arith.constant dense<0.000000e+00> : vector<8xf32>
    %27 = vector.multi_reduction <add>, %26, %cst_19 [1] : vector<8x4xf32> to vector<8xf32>
    %28 = vector.shape_cast %27 : vector<8xf32> to vector<8x1xf32>
    %cst_20 = arith.constant -5.000000e-01 : f32
    %29 = vector.broadcast %cst_20 : f32 to vector<8x1xf32>
    %30 = arith.mulf %29, %28 : vector<8x1xf32>
    %31 = tpu.concatenate %30, %21 in 1 : vector<8x1xf32>, vector<8x1xf32> -> vector<8x2xf32>
    %c0_21 = arith.constant 0 : index
    %c0_22 = arith.constant 0 : index
    %32 = vector.load %arg10[%c0_21, %c0_22] : memref<8x2xf32, #tpu.memory_space<vmem>>, vector<8x2xf32>
    tpu.vector_store %arg10[%c0_21, %c0_22], %31 {strides = array<i32>} : memref<8x2xf32, #tpu.memory_space<vmem>>, vector<8x2xf32>,
    return
  }
  func.func @transform_0(%arg0: i32) -> (i32, i32) {
    %c0_i32 = arith.constant 0 : i32
    %c0_i32_0 = arith.constant 0 : i32
    return %arg0, %c0_i32 : i32, i32
  }
  func.func @transform_1(%arg0: i32) -> (i32, i32) {
    %c0_i32 = arith.constant 0 : i32
    %c0_i32_0 = arith.constant 0 : i32
    return %arg0, %c0_i32 : i32, i32
  }
  func.func @transform_2(%arg0: i32) -> (i32, i32) {
    %c0_i32 = arith.constant 0 : i32
    %c0_i32_0 = arith.constant 0 : i32
    %c0_i32_1 = arith.constant 0 : i32
    return %c0_i32, %c0_i32_0 : i32, i32
  }
  func.func @transform_3(%arg0: i32) -> (i32, i32) {
    %c0_i32 = arith.constant 0 : i32
    %c0_i32_0 = arith.constant 0 : i32
    %c0_i32_1 = arith.constant 0 : i32
    return %c0_i32, %c0_i32_0 : i32, i32
  }
  func.func @transform_4(%arg0: i32) -> (i32, i32) {
    %c0_i32 = arith.constant 0 : i32
    %c0_i32_0 = arith.constant 0 : i32
    %c0_i32_1 = arith.constant 0 : i32
    return %c0_i32, %c0_i32_0 : i32, i32
  }
  func.func @transform_5(%arg0: i32) -> (i32, i32) {
    %c0_i32 = arith.constant 0 : i32
    %c0_i32_0 = arith.constant 0 : i32
    %c0_i32_1 = arith.constant 0 : i32
    return %c0_i32, %c0_i32_0 : i32, i32
  }
  func.func @transform_6(%arg0: i32) -> (i32, i32) {
    %c0_i32 = arith.constant 0 : i32
    %c0_i32_0 = arith.constant 0 : i32
    %c0_i32_1 = arith.constant 0 : i32
    return %c0_i32, %c0_i32_0 : i32, i32
  }
  func.func @transform_7(%arg0: i32) -> (i32, i32) {
    %c0_i32 = arith.constant 0 : i32
    %c0_i32_0 = arith.constant 0 : i32
    %c0_i32_1 = arith.constant 0 : i32
    return %c0_i32, %c0_i32_0 : i32, i32
  }
  func.func @transform_8(%arg0: i32) -> (i32, i32) {
    %c0_i32 = arith.constant 0 : i32
    %c0_i32_0 = arith.constant 0 : i32
    %c0_i32_1 = arith.constant 0 : i32
    return %c0_i32, %c0_i32_0 : i32, i32
  }
  func.func @transform_9(%arg0: i32) -> (i32, i32) {
    %c0_i32 = arith.constant 0 : i32
    %c0_i32_0 = arith.constant 0 : i32
    return %arg0, %c0_i32 : i32, i32
  }
}

</mosaic_0001>

<bundles_post_ra>
// kernel: ppo_evaluate.1
= control target key start
LH: loop header
LB: loop body
LE: loop exit
PB: predicated region body
PF: predicated region fallthrough
CT: control target
= control target key end

     0   :  { %vm42_vm0 = vcmask 64512   ;;  %v457_v0 = vmov 0.0   ;;  %vm458_vm1 = vmmov 0   ;;  %vm315_vm2 = vcmask 31744   ;;  %s669_s2 = inlined_call_operand.vmem [shape: f32[8,128], index: 2, kind: input, shape index: {}]   ;;  %s670_s0 = inlined_call_operand.vmem [shape: f32[8,8], index: 0, kind: input, shape index: {}]   ;;  %s671_s4 = inlined_call_operand.vmem [shape: f32[128,128], index: 4, kind: input, shape index: {}]   ;;  %s672_s6 = inlined_call_operand.vmem [shape: f32[128,5], index: 6, kind: input, shape index: {}]   ;;  %s673_s3 = inlined_call_operand.vmem [shape: f32[1,128], index: 3, kind: input, shape index: {}]   ;;  %s674_s5 = inlined_call_operand.vmem [shape: f32[1,128], index: 5, kind: input, shape index: {}]   ;;  %s675_s7 = inlined_call_operand.vmem [shape: f32[1,5], index: 7, kind: input, shape index: {}]   ;;  %s676_s1 = inlined_call_operand.vmem [shape: f32[8,4], index: 1, kind: input, shape index: {}]   ;;  %s677_s8 = inlined_call_operand.vmem [shape: f32[1,4], index: 8, kind: input, shape index: {}]   ;;  %s678_s9 = inlined_call_operand.vmem [shape: f32[8,2], index: 9, kind: output, shape index: {}]  }
   0x1   :  { %373 = vmatprep.subr.mxu0 %v457_v0  ;;  %v34_v1 = vld [vmem:[%s669_s2] sm:$0xff]  ;;  %375 = vmatprep.mubr.msk.f32.mxu0 %vm458_vm1, %v457_v0  ;;  %v132_v3 = vld [vmem:[%s671_s4 + $0x78] sm:$0xff]  ;;  %v131_v4 = vld [vmem:[%s671_s4 + $0x70] sm:$0xff]  ;;  %vm324_vm3 = vcmask 7168   ;;  %vm326_vm4 = vcmask 15360  }
   0x2   :  { %v32_v2 = vld [vmem:[%s670_s0] sm:$0xff]  ;;  %374 = vmatpush3.msra.mxu0 %v34_v1  ;;  %378 = vmatprep.subr.mxu1 %v457_v0  ;;  %v130_v5 = vld [vmem:[%s671_s4 + $0x68] sm:$0xff]  ;;  %v128_v7 = vld [vmem:[%s671_s4 + $0x58] sm:$0xff] }
   0x3   :  { %376 = vmatmul.mubr.msk.f32.vlgmr.msra.gmra.mxu0 %vm42_vm0, %v32_v2  ;;  %379 = vmatpush3.msra.mxu1 %v132_v3  ;;  %v129_v6 = vld [vmem:[%s671_s4 + $0x60] sm:$0xff]  ;;  %v127_v8 = vld [vmem:[%s671_s4 + $0x50] sm:$0xff]  ;;  %v126_v9 = vld [vmem:[%s671_s4 + $0x48] sm:$0xff] }
   0x4   :  { %380 = vmatprep.subr.mxu1 %v457_v0  ;;  %410 = vmatprep.mubr.msk.f32.mxu1 %vm458_vm1, %v457_v0  ;;  %v125_v10 = vld [vmem:[%s671_s4 + $0x40] sm:$0xff]  ;;  %v124_v11 = vld [vmem:[%s671_s4 + $0x38] sm:$0xff]  ;;  %v123_v12 = vld [vmem:[%s671_s4 + $0x30] sm:$0xff] }
   0x5   :  { %381 = vmatpush3.msra.mxu1 %v131_v4  ;;  %413 = vmatprep.subr.mxu0 %v457_v0  ;;  %v122_v13 = vld [vmem:[%s671_s4 + $0x28] sm:$0xff]  ;;  %v121_v14 = vld [vmem:[%s671_s4 + $0x20] sm:$0xff]  ;;  %v120_v15 = vld [vmem:[%s671_s4 + $0x18] sm:$0xff] }
   0x6   :  { %382 = vmatprep.subr.mxu1 %v457_v0  ;;  %445 = vmatprep.mubr.msk.f32.mxu0 %vm458_vm1, %v457_v0  ;;  %v119_v16 = vld [vmem:[%s671_s4 + $0x10] sm:$0xff]  ;;  %v118_v17 = vld [vmem:[%s671_s4 + $0x8] sm:$0xff]  ;;  %v117_v18 = vld [vmem:[%s671_s4] sm:$0xff] }
   0x7   :  { %383 = vmatpush3.msra.mxu1 %v130_v5  ;;  %v226_v19 = vld [vmem:[%s672_s6 + $0x78] sm:$0xff]  ;;  %v225_v20 = vld [vmem:[%s672_s6 + $0x70] sm:$0xff]  ;;  %v224_v21 = vld [vmem:[%s672_s6 + $0x68] sm:$0xff] }
   0x8   :  { %384 = vmatprep.subr.mxu1 %v457_v0  ;;  %414 = vmatpush3.msra.mxu0 %v226_v19  ;;  %v223_v22 = vld [vmem:[%s672_s6 + $0x60] sm:$0xff]  ;;  %v222_v23 = vld [vmem:[%s672_s6 + $0x58] sm:$0xff]  ;;  %v221_v24 = vld [vmem:[%s672_s6 + $0x50] sm:$0xff] }
   0x9   :  { %385 = vmatpush3.msra.mxu1 %v129_v6  ;;  %415 = vmatprep.subr.mxu0 %v457_v0  ;;  %v220_v25 = vld [vmem:[%s672_s6 + $0x48] sm:$0xff]  ;;  %v332_v26 = vld [vmem:[%s673_s3] ss:$0 sm:$0xff]  ;;  %v218_v32 = vld [vmem:[%s672_s6 + $0x38] sm:$0xff] }
   0xa   :  { %386 = vmatprep.subr.mxu1 %v457_v0  ;;  %416 = vmatpush3.msra.mxu0 %v225_v20  ;;  %v219_v31 = vld [vmem:[%s672_s6 + $0x40] sm:$0xff]  ;;  %v217_v33 = vld [vmem:[%s672_s6 + $0x30] sm:$0xff]  ;;  %v216_v34 = vld [vmem:[%s672_s6 + $0x28] sm:$0xff] }
   0xb   :  { %387 = vmatpush3.msra.mxu1 %v128_v7  ;;  %417 = vmatprep.subr.mxu0 %v457_v0  ;;  %v215_v35 = vld [vmem:[%s672_s6 + $0x20] sm:$0xff]  ;;  %v214_v36 = vld [vmem:[%s672_s6 + $0x18] sm:$0xff]  ;;  %v213_v37 = vld [vmem:[%s672_s6 + $0x10] sm:$0xff] }
   0xc   :  { %388 = vmatprep.subr.mxu1 %v457_v0  ;;  %418 = vmatpush3.msra.mxu0 %v224_v21  ;;  %v212_v38 = vld [vmem:[%s672_s6 + $0x8] sm:$0xff]  ;;  %v211_v39 = vld [vmem:[%s672_s6] sm:$0xff] }
   0xd   :  { %389 = vmatpush3.msra.mxu1 %v127_v8  ;;  %419 = vmatprep.subr.mxu0 %v457_v0  ;;  %v334_v40 = vld [vmem:[%s674_s5] ss:$0 sm:$0xff] }
   0xe   :  { %390 = vmatprep.subr.mxu1 %v457_v0  ;;  %420 = vmatpush3.msra.mxu0 %v223_v22  ;;  %v335_v45 = vld [vmem:[%s675_s7] ss:$0 sm:$0xff]  ;;  %s459_s7 = smov 125  }
   0xf   :  { %391 = vmatpush3.msra.mxu1 %v126_v9  ;;  %421 = vmatprep.subr.mxu0 %v457_v0  ;;  %v33_v49 = vld [vmem:[%s676_s1] sm:$0xff] }
  0x10   :  { %392 = vmatprep.subr.mxu1 %v457_v0  ;;  %422 = vmatpush3.msra.mxu0 %v222_v23  ;;  %v336_v52 = vld [vmem:[%s677_s8] ss:$0 sm:$0xff] }
  0x11   :  { %393 = vmatpush3.msra.mxu1 %v125_v10  ;;  %423 = vmatprep.subr.mxu0 %v457_v0 }
  0x12   :  { %394 = vmatprep.subr.mxu1 %v457_v0  ;;  %424 = vmatpush3.msra.mxu0 %v221_v24 }
  0x13   :  { %395 = vmatpush3.msra.mxu1 %v124_v11  ;;  %425 = vmatprep.subr.mxu0 %v457_v0 }
  0x14   :  { %396 = vmatprep.subr.mxu1 %v457_v0  ;;  %426 = vmatpush3.msra.mxu0 %v220_v25 }
  0x15   :  { %397 = vmatpush3.msra.mxu1 %v123_v12  ;;  %427 = vmatprep.subr.mxu0 %v457_v0 }
  0x16   :  { %398 = vmatprep.subr.mxu1 %v457_v0  ;;  %428 = vmatpush3.msra.mxu0 %v219_v31 }
  0x17   :  { %399 = vmatpush3.msra.mxu1 %v122_v13  ;;  %429 = vmatprep.subr.mxu0 %v457_v0 }
  0x18   :  { %400 = vmatprep.subr.mxu1 %v457_v0  ;;  %430 = vmatpush3.msra.mxu0 %v218_v32 }
  0x19   :  { %401 = vmatpush3.msra.mxu1 %v121_v14  ;;  %431 = vmatprep.subr.mxu0 %v457_v0 }
  0x1a   :  { %402 = vmatprep.subr.mxu1 %v457_v0  ;;  %432 = vmatpush3.msra.mxu0 %v217_v33 }
  0x1b   :  { %403 = vmatpush3.msra.mxu1 %v120_v15  ;;  %433 = vmatprep.subr.mxu0 %v457_v0 }
  0x1c   :  { %404 = vmatprep.subr.mxu1 %v457_v0  ;;  %434 = vmatpush3.msra.mxu0 %v216_v34 }
  0x1d   :  { %405 = vmatpush3.msra.mxu1 %v119_v16  ;;  %435 = vmatprep.subr.mxu0 %v457_v0 }
  0x1e   :  { %406 = vmatprep.subr.mxu1 %v457_v0  ;;  %436 = vmatpush3.msra.mxu0 %v215_v35 }
  0x1f   :  { %407 = vmatpush3.msra.mxu1 %v118_v17  ;;  %437 = vmatprep.subr.mxu0 %v457_v0 }
  0x20   :  { %408 = vmatprep.subr.mxu1 %v457_v0  ;;  %438 = vmatpush3.msra.mxu0 %v214_v36 }
  0x21   :  { %409 = vmatpush3.msra.mxu1 %v117_v18  ;;  %439 = vmatprep.subr.mxu0 %v457_v0 }
  0x22   :  { %440 = vmatpush3.msra.mxu0 %v213_v37 }
  0x23   :  { %441 = vmatprep.subr.mxu0 %v457_v0 }
  0x24   :  { %442 = vmatpush3.msra.mxu0 %v212_v38 }
  0x25   :  { %443 = vmatprep.subr.mxu0 %v457_v0 }
  0x26   :  { %444 = vmatpush3.msra.mxu0 %v211_v39 }
  0xc3   :  { %v112_v27 = vpop.f32.mrf.mxu0 }
  0xc4   :  { %v113_v28 = vadd.f32 %v332_v26, %v112_v27 }
  0xc5   :  { %v377_v29 = vpop.f32.mrf.mxu0 }
  0xc6   :  { %451 = vtanh.f32 %v113_v28 }
  0xd3   :  { %v452_v30 = vpop.eup %451 }
  0xd4   :  { %411 = vmatmul.mubr.f32.vlgmr.msra.gmra.mxu1 %v452_v30 }
 0x194   :  { %v206_v41 = vpop.f32.mrf.mxu1 }
 0x195   :  { %v207_v42 = vadd.f32 %v334_v40, %v206_v41 }
 0x196   :  { %v412_v43 = vpop.f32.mrf.mxu1 }
 0x197   :  { %453 = vtanh.f32 %v207_v42 }
 0x1a4   :  { %v454_v44 = vpop.eup %453 }
 0x1a5   :  { %446 = vmatmul.mubr.f32.vlgmr.msra.gmra.mxu0 %v454_v44 }
 0x265   :  { %v300_v46 = vpop.f32.mrf.mxu0 }
 0x266   :  { %v301_v47 = vadd.f32 %v335_v45, %v300_v46 }
 0x267   :  { %v447_v48 = vpop.f32.mrf.mxu0 }
 0x268   :  { %455 = vtanh.f32 %v301_v47 }
 0x275   :  { %v456_v50 = vpop.eup %455 }
 0x276   :  { %v305_v51 = vsub.f32 %v33_v49, %v456_v50 }
 0x278   :  { %v306_v53 = vmul.f32 %v305_v51, %v305_v51 }
 0x27a   :  { %v314_v54 = vmul.f32 %v336_v52, %v306_v53 }
 0x27c   :  { %v316_v55 = vsel %vm315_vm2, %v314_v54, 0.0 }
 0x27d   :  { %317 = vadd.xlane.f32.xlu0 %v316_v55 }
 0x293   :  { %321 = vrot.lane.b32.xlu0 %v301_v47, %s459_s7 }
 0x306   :  { %v318_v56 = vpop.xlane.xlu0 %317 }
 0x307   :  { %v319_v57 = vmul.f32 -0.5, %v318_v56 }
 0x30a   :  { %v322_v58 = vpop.permute.xlu0 %321 }
 0x30b   :  { %v325_v59 = vsel %vm324_vm3, %v319_v57, %v322_v58 }
 0x30c   :  { %327 = vst.msk [vmem:[%s678_s9] sm:$0xff] %vm326_vm4, %v325_v59 }

</bundles_post_ra>
